<compile_context>
chip_gen: v7x
topology: tpu7x:2x2x1
jax: 0.10.0
libtpu: 0.0.40
codegen_flags: <defaults>
</compile_context>

<pallas_src>
import functools

import jax
import jax.numpy as jnp
from jax.experimental import pallas as pl
from jax.experimental.pallas import tpu as pltpu


def _round_up(x, m):
    return ((x + m - 1) // m) * m


def _cdiv(a, b):
    return -(-a // b)


_VMEM_BUDGET = 24 << 20     # conservative live-block budget (fits v7x 64 MiB)
_VMEM_CAP = 60 << 20        # never request more scoped VMEM than v7x has


def _vmem_limit(block_bytes, scratch_bytes=0):
    """Explicit scoped-VMEM request: double-buffered blocks + scratch + slack."""
    need = 2 * block_bytes + scratch_bytes + (4 << 20)
    return int(min(max(need, 32 << 20), _VMEM_CAP))


def _pick_row_tile(m, bytes_per_row, *, max_tile=1024):
    tm = min(max_tile, _round_up(m, 8))
    while tm > 8 and tm * bytes_per_row > _VMEM_BUDGET:
        tm = max(8, _round_up(tm // 2, 8))
    return tm


# ------------------------------------------------------------------ kernels

def _linear_kernel(x_ref, w_ref, b_ref, o_ref):
    acc = jnp.dot(x_ref[...], w_ref[...], preferred_element_type=jnp.float32)
    o_ref[...] = (acc + b_ref[...]).astype(o_ref.dtype)


def linear_rows(x_rows, w, b, *, out_dtype=jnp.bfloat16, max_tile=1024):
    """(M, Cin) @ (Cin, Cout) + bias, row-tiled, parallel grid."""
    M, Cin = x_rows.shape
    Cout = w.shape[1]
    out_size = jnp.dtype(out_dtype).itemsize
    per_row = 2 * (Cin * x_rows.dtype.itemsize + Cout * out_size) + Cout * 4
    tm = _pick_row_tile(M, per_row, max_tile=max_tile)
    Mp = _round_up(M, tm)
    if Mp != M:
        x_rows = jnp.pad(x_rows, ((0, Mp - M), (0, 0)))
    block_bytes = (tm * Cin * x_rows.dtype.itemsize
                   + Cin * Cout * w.dtype.itemsize + Cout * 4
                   + tm * Cout * out_size)
    bytes_acc = (Mp * Cin * x_rows.dtype.itemsize
                 + Cin * Cout * w.dtype.itemsize + Cout * 4
                 + Mp * Cout * out_size)
    out = pl.pallas_call(
        _linear_kernel,
        out_shape=jax.ShapeDtypeStruct((Mp, Cout), out_dtype),
        grid=(Mp // tm,),
        in_specs=[
            pl.BlockSpec((tm, Cin), lambda i: (i, 0)),
            # NOTE: constant-index weight/bias blocks; pl.Buffered(1) would
            # reclaim their redundant second buffer on VMEM-tight chips (v7x).
            pl.BlockSpec((Cin, Cout), lambda i: (0, 0)),
            pl.BlockSpec((1, Cout), lambda i: (0, 0)),
        ],
        out_specs=pl.BlockSpec((tm, Cout), lambda i: (i, 0)),
        compiler_params=pltpu.CompilerParams(
            dimension_semantics=("parallel",),
            vmem_limit_bytes=_vmem_limit(block_bytes)),
        cost_estimate=pl.CostEstimate(flops=int(2 * Mp * Cin * Cout),
                                      transcendentals=0,
                                      bytes_accessed=int(bytes_acc)),
    )(x_rows, w, b)
    return out[:M] if Mp != M else out


def _sr_kv_kernel(p_ref, wsr_ref, bsr_ref, g_ref, beta_ref, wkv_ref, bkv_ref,
                  o_ref, *, eps):
    # sr conv (as non-overlapping patch matmul) -> LayerNorm (f32) -> kv proj.
    h = jnp.dot(p_ref[...], wsr_ref[...],
                preferred_element_type=jnp.float32) + bsr_ref[...]
    mu = jnp.mean(h, axis=-1, keepdims=True)
    var = jnp.mean(jnp.square(h - mu), axis=-1, keepdims=True)
    hn = (h - mu) * jax.lax.rsqrt(var + eps)
    hn = hn * g_ref[...] + beta_ref[...]
    kv = jnp.dot(hn.astype(wkv_ref.dtype), wkv_ref[...],
                 preferred_element_type=jnp.float32)
    o_ref[...] = (kv + bkv_ref[...]).astype(o_ref.dtype)


def sr_kv_rows(patches, w_sr, b_sr, gamma, beta, w_kv, b_kv, *, eps=1e-5,
               out_dtype=jnp.bfloat16, max_tile=1024):
    """Fused spatial-reduction conv + LayerNorm + kv projection over row tiles."""
    M, P = patches.shape
    C = w_sr.shape[1]
    C2 = w_kv.shape[1]
    out_size = jnp.dtype(out_dtype).itemsize
    per_row = (2 * (P * patches.dtype.itemsize + C2 * out_size)
               + C * 4 + C2 * 4)                       # f32 intermediates
    tm = _pick_row_tile(M, per_row, max_tile=max_tile)
    Mp = _round_up(M, tm)
    if Mp != M:
        patches = jnp.pad(patches, ((0, Mp - M), (0, 0)))
    block_bytes = (tm * P * patches.dtype.itemsize
                   + P * C * w_sr.dtype.itemsize + 3 * C * 4
                   + C * C2 * w_kv.dtype.itemsize + C2 * 4
                   + tm * C2 * out_size)
    flops = 2 * Mp * (P * C + C * C2)
    bytes_acc = (Mp * P * patches.dtype.itemsize
                 + P * C * w_sr.dtype.itemsize
                 + C * C2 * w_kv.dtype.itemsize
                 + Mp * C2 * out_size)
    out = pl.pallas_call(
        functools.partial(_sr_kv_kernel, eps=eps),
        out_shape=jax.ShapeDtypeStruct((Mp, C2), out_dtype),
        grid=(Mp // tm,),
        in_specs=[
            pl.BlockSpec((tm, P), lambda i: (i, 0)),
            pl.BlockSpec((P, C), lambda i: (0, 0)),
            pl.BlockSpec((1, C), lambda i: (0, 0)),
            pl.BlockSpec((1, C), lambda i: (0, 0)),
            pl.BlockSpec((1, C), lambda i: (0, 0)),
            pl.BlockSpec((C, C2), lambda i: (0, 0)),
            pl.BlockSpec((1, C2), lambda i: (0, 0)),
        ],
        out_specs=pl.BlockSpec((tm, C2), lambda i: (i, 0)),
        compiler_params=pltpu.CompilerParams(
            dimension_semantics=("parallel",),
            vmem_limit_bytes=_vmem_limit(block_bytes)),
        cost_estimate=pl.CostEstimate(flops=int(flops),
                                      transcendentals=int(Mp),
                                      bytes_accessed=int(bytes_acc)),
    )(patches, w_sr, b_sr, gamma, beta, w_kv, b_kv)
    return out[:M] if Mp != M else out


def _attn_proj_kernel(x_ref, wq_ref, bq_ref, k_ref, v_ref, wp_ref, bp_ref,
                      o_ref, ctx_ref, *, num_heads, head_dim, kv_len):
    """Fused q-proj + per-head softmax attention + full-width output proj.

    * K arrives pre-transposed (1, H, head_dim, d_pad), V as (1, H, d_pad,
      head_dim): head indexing is pure leading-axis addressing, no kh.T.
    * The softmax scale is already folded into wq/bq.
    * Per-head context is written into the (tq, C) VMEM scratch so the output
      projection is ONE full-contraction (tq, C) @ (C, C) matmul (no split-K
      over head_dim) and per-iteration live ranges stay bounded.
    * q is produced by a single full-width (C, C) matmul (best MXU fill);
      per-head access uses static lane slices, which costs a little XLU filler
      but avoids H narrow-N (C, head_dim) matmuls (H x the MXU passes).
    """
    x = x_ref[0]                                             # (tq, C) bf16
    q = jnp.dot(x, wq_ref[...],
                preferred_element_type=jnp.float32) + bq_ref[...]
    q = q.astype(x.dtype)                                    # (tq, C)
    d_pad = k_ref.shape[-1]
    if d_pad != kv_len:                                      # padded keys -> -inf
        key_mask = jax.lax.broadcasted_iota(jnp.int32, (1, d_pad), 1) < kv_len
    for h in range(num_heads):                               # small, unrolled
        lo = h * head_dim
        qh = q[:, lo:lo + head_dim]                          # (tq, hd)
        kh = k_ref[0, h]                                     # (hd, d_pad)
        vh = v_ref[0, h]                                     # (d_pad, hd)
        s = jnp.dot(qh, kh, preferred_element_type=jnp.float32)
        if d_pad != kv_len:
            s = jnp.where(key_mask, s, -jnp.inf)
        s = s - jnp.max(s, axis=-1, keepdims=True)
        p = jnp.exp(s)
        inv = pl.reciprocal(jnp.sum(p, axis=-1, keepdims=True), approx=False)
        p = (p * inv).astype(vh.dtype)
        ctx_ref[:, lo:lo + head_dim] = jnp.dot(
            p, vh, preferred_element_type=jnp.float32).astype(ctx_ref.dtype)
    out = jnp.dot(ctx_ref[...], wp_ref[...],
                  preferred_element_type=jnp.float32) + bp_ref[...]
    o_ref[0] = out.astype(o_ref.dtype)


def attention_proj(x_b, k_b, v_b, w_q, b_q, w_proj, b_proj, *, num_heads,
                   kv_len, out_dtype=None, max_tile_q=1024):
    """x_b: (B, HW, C); k_b: (B, H, hd, d_pad); v_b: (B, H, d_pad, hd)."""
    B, HW, C = x_b.shape
    _, H, head_dim, d_pad = k_b.shape
    assert H == num_heads and head_dim * num_heads == C
    out_dtype = x_b.dtype if out_dtype is None else out_dtype
    in_size = x_b.dtype.itemsize
    out_size = jnp.dtype(out_dtype).itemsize

    # VMEM-aware query tile (v7x has only 64 MiB physical VMEM).
    per_row = (2 * C * in_size + 2 * C * out_size   # x / out (double-buffered)
               + C * 4 + C * in_size                # q (f32) + ctx scratch
               + 2 * d_pad * 4)                     # scores + probs (one head)
    kv_bytes = 2 * (2 * H * head_dim * d_pad * in_size)   # K+V double-buffered
    budget = max(_VMEM_BUDGET - kv_bytes, 4 << 20)
    tq = min(max_tile_q, _round_up(HW, 8))
    while tq > 8 and tq * per_row > budget:
        tq = max(8, _round_up(tq // 2, 8))
    # keep >= 2 grid cells so dual-TensorCore chips (v7x) get work on both TCs
    while B * _cdiv(HW, tq) < 2 and tq > 8:
        tq = max(8, _round_up(_cdiv(tq, 2), 8))
    HWp = _round_up(HW, tq)
    if HWp != HW:
        x_b = jnp.pad(x_b, ((0, 0), (0, HWp - HW), (0, 0)))

    block_bytes = (tq * C * in_size
                   + 2 * C * C * w_q.dtype.itemsize + 2 * C * 4
                   + 2 * H * head_dim * d_pad * in_size
                   + tq * C * out_size)
    scratch_bytes = tq * C * in_size
    flops = 2 * B * HWp * (2 * C * C + 2 * C * d_pad)
    bytes_acc = (B * HWp * C * (in_size + out_size)
                 + 2 * B * H * head_dim * d_pad * in_size
                 + 2 * C * C * w_q.dtype.itemsize + 2 * C * 4)
    out = pl.pallas_call(
        functools.partial(_attn_proj_kernel, num_heads=num_heads,
                          head_dim=head_dim, kv_len=kv_len),
        out_shape=jax.ShapeDtypeStruct((B, HWp, C), out_dtype),
        grid=(B, HWp // tq),
        in_specs=[
            pl.BlockSpec((1, tq, C), lambda b, i: (b, i, 0)),
            # NOTE: constant-index weight/bias/KV blocks; pl.Buffered(1) would
            # drop their redundant second buffer on VMEM-tight chips (v7x).
            pl.BlockSpec((C, C), lambda b, i: (0, 0)),
            pl.BlockSpec((1, C), lambda b, i: (0, 0)),
            pl.BlockSpec((1, H, head_dim, d_pad), lambda b, i: (b, 0, 0, 0)),
            pl.BlockSpec((1, H, d_pad, head_dim), lambda b, i: (b, 0, 0, 0)),
            pl.BlockSpec((C, C), lambda b, i: (0, 0)),
            pl.BlockSpec((1, C), lambda b, i: (0, 0)),
        ],
        out_specs=pl.BlockSpec((1, tq, C), lambda b, i: (b, i, 0)),
        scratch_shapes=[pltpu.VMEM((tq, C), x_b.dtype)],
        compiler_params=pltpu.CompilerParams(
            dimension_semantics=("parallel", "parallel"),
            vmem_limit_bytes=_vmem_limit(block_bytes, scratch_bytes)),
        cost_estimate=pl.CostEstimate(
            flops=int(flops),
            transcendentals=int(B * HWp * d_pad * num_heads),
            bytes_accessed=int(bytes_acc)),
    )(x_b, w_q, b_q, k_b, v_b, w_proj, b_proj)
    return out[:, :HW, :] if HWp != HW else out


# ------------------------------------------------------------------ forward

def _split_heads_kv(kv_rows, batch, d, num_heads, *, lane_pad=128):
    """(B*d, 2C) packed kv rows -> K:(B,H,hd,d_pad) (pre-transposed), V:(B,H,d_pad,hd).

    Channel order matches the PyTorch rearrange 'b d (a m c) -> a b m d c'.
    d is zero-padded to a lane multiple; padded keys are masked in-kernel.
    """
    C2 = kv_rows.shape[-1]
    C = C2 // 2
    hd = C // num_heads
    kv = kv_rows.reshape(batch, d, 2, num_heads, hd)
    k = jnp.transpose(kv[:, :, 0], (0, 2, 3, 1))   # (B, H, hd, d) -- K^T per head
    v = jnp.transpose(kv[:, :, 1], (0, 2, 1, 3))   # (B, H, d, hd)
    d_pad = _round_up(d, lane_pad)
    if d_pad != d:
        k = jnp.pad(k, ((0, 0), (0, 0), (0, 0), (0, d_pad - d)))
        v = jnp.pad(v, ((0, 0), (0, 0), (0, d_pad - d), (0, 0)))
    return k, v


def efficient_self_attention_forward(x, h, w, params, *, num_heads, sr_ratio,
                                     dropout_p=0.0,
                                     compute_dtype=jnp.bfloat16,
                                     out_dtype=None):
    """x: (B, h*w, C).  Eval-mode forward of the PyTorch module."""
    del dropout_p  # TODO(synk): training-mode dropout not implemented (eval == identity).
    B, HW, C = x.shape
    assert HW == h * w and C % num_heads == 0
    head_dim = C // num_heads
    scale = float(head_dim) ** -0.5

    xc = x.astype(compute_dtype)

    # ---- kv path: optional sequence reduction (conv k=s=sr) + LN + kv proj ----
    if sr_ratio > 1:
        hr, wr = h // sr_ratio, w // sr_ratio
        # non-overlapping sr x sr patches, (ci, kh, kw)-ordered to match the
        # PyTorch Conv2d weight layout (Cout, Cin, kh, kw).
        patches = (xc.reshape(B, hr, sr_ratio, wr, sr_ratio, C)
                     .transpose(0, 1, 3, 5, 2, 4)
                     .reshape(B * hr * wr, C * sr_ratio * sr_ratio))
        kv_rows = sr_kv_rows(patches, params['w_sr'], params['b_sr'],
                             params['ln_gamma'], params['ln_beta'],
                             params['w_kv'], params['b_kv'],
                             out_dtype=compute_dtype)
        d = hr * wr
    else:
        kv_rows = linear_rows(xc.reshape(B * HW, C), params['w_kv'],
                              params['b_kv'], out_dtype=compute_dtype)
        d = HW

    # Head-leading, pre-transposed K / V with lane-padded KV sequence.
    k_b, v_b = _split_heads_kv(kv_rows, B, d, num_heads)

    # Fold the softmax scale into the q projection (no per-head score scaling).
    w_q = (params['w_q'].astype(jnp.float32) * scale).astype(compute_dtype)
    b_q = params['b_q'] * scale

    out = attention_proj(
        xc, k_b, v_b, w_q, b_q,
        params['w_proj'].astype(compute_dtype), params['b_proj'],
        num_heads=num_heads, kv_len=d,
        out_dtype=compute_dtype if out_dtype is None else out_dtype)
    return out


# ------------------------------------------------------------------ params

def init_params(key, attn_dim, num_heads, sr_ratio, dtype=jnp.bfloat16):
    assert attn_dim % num_heads == 0
    C = attn_dim
    ks = jax.random.split(key, 8)

    def lin(k, cin, cout):
        s = (1.0 / cin) ** 0.5
        return jax.random.uniform(k, (cin, cout), jnp.float32, -s, s)

    p = dict(
        w_q=lin(ks[0], C, C).astype(dtype),
        b_q=jax.random.uniform(ks[1], (1, C), jnp.float32, -0.1, 0.1),
        w_kv=lin(ks[2], C, 2 * C).astype(dtype),
        b_kv=jax.random.uniform(ks[3], (1, 2 * C), jnp.float32, -0.1, 0.1),
        w_proj=lin(ks[4], C, C).astype(dtype),
        b_proj=jax.random.uniform(ks[5], (1, C), jnp.float32, -0.1, 0.1),
    )
    if sr_ratio > 1:
        P = C * sr_ratio * sr_ratio
        p['w_sr'] = lin(ks[6], P, C).astype(dtype)
        p['b_sr'] = jax.random.uniform(ks[7], (1, C), jnp.float32, -0.1, 0.1)
        p['ln_gamma'] = jnp.ones((1, C), jnp.float32)
        p['ln_beta'] = jnp.zeros((1, C), jnp.float32)
    return p


# -------------------------------------------------------------------- main

if __name__ == "__main__":
    key = jax.random.PRNGKey(0)
    B, h, w = 2, 8, 8              # sequence length HW = 64
    attn_dim, num_heads = 32, 2
    k_x, k_p1, k_p2 = jax.random.split(key, 3)
    x = jax.random.normal(k_x, (B, h * w, attn_dim), jnp.float32)

    # sr_ratio = 2 path (spatial-reduction conv + LayerNorm fused into kv kernel)
    params2 = init_params(k_p1, attn_dim, num_heads, sr_ratio=2)
    out2 = efficient_self_attention_forward(x, h, w, params2,
                                            num_heads=num_heads, sr_ratio=2,
                                            dropout_p=0.1)
    out2 = jax.block_until_ready(out2)
    assert out2.shape == (B, h * w, attn_dim), out2.shape
    assert bool(jnp.all(jnp.isfinite(out2.astype(jnp.float32))))

    # sr_ratio = 1 path (plain kv projection)
    params1 = init_params(k_p2, attn_dim, num_heads, sr_ratio=1)
    out1 = efficient_self_attention_forward(x, h, w, params1,
                                            num_heads=num_heads, sr_ratio=1,
                                            dropout_p=0.1)
    out1 = jax.block_until_ready(out1)
    assert out1.shape == (B, h * w, attn_dim), out1.shape
    assert bool(jnp.all(jnp.isfinite(out1.astype(jnp.float32))))

    print("KERNEL_OK")
</pallas_src>

<mosaic_0001>
module attributes {stable_mosaic.version = 11 : i64} {
  func.func @_sr_kv_kernel(%arg0: i32, %arg1: memref<32x128xbf16, #tpu.memory_space<vmem>>, %arg2: memref<128x32xbf16, #tpu.memory_space<vmem>>, %arg3: memref<1x32xf32, #tpu.memory_space<vmem>>, %arg4: memref<1x32xf32, #tpu.memory_space<vmem>>, %arg5: memref<1x32xf32, #tpu.memory_space<vmem>>, %arg6: memref<32x64xbf16, #tpu.memory_space<vmem>>, %arg7: memref<1x64xf32, #tpu.memory_space<vmem>>, %arg8: memref<32x64xbf16, #tpu.memory_space<vmem>>) attributes {dimension_semantics = [#tpu.dimension_semantics<parallel>], iteration_bounds = array<i64: 1>, scalar_prefetch = 0 : i64, scratch_operands = 0 : i64, tpu.core_type = #tpu.core_type<tc>, window_params = [{transform_indices = @transform_0, window_bounds = array<i64: 32, 128>}, {pipeline_mode = #tpu.pipeline_mode<synchronous>, transform_indices = @transform_1, window_bounds = array<i64: 128, 32>}, {pipeline_mode = #tpu.pipeline_mode<synchronous>, transform_indices = @transform_2, window_bounds = array<i64: 1, 32>}, {pipeline_mode = #tpu.pipeline_mode<synchronous>, transform_indices = @transform_3, window_bounds = array<i64: 1, 32>}, {pipeline_mode = #tpu.pipeline_mode<synchronous>, transform_indices = @transform_4, window_bounds = array<i64: 1, 32>}, {pipeline_mode = #tpu.pipeline_mode<synchronous>, transform_indices = @transform_5, window_bounds = array<i64: 32, 64>}, {pipeline_mode = #tpu.pipeline_mode<synchronous>, transform_indices = @transform_6, window_bounds = array<i64: 1, 64>}, {transform_indices = @transform_7, window_bounds = array<i64: 32, 64>}]} {
    %c0 = arith.constant 0 : index
    %c0_0 = arith.constant 0 : index
    %0 = vector.load %arg1[%c0, %c0_0] : memref<32x128xbf16, #tpu.memory_space<vmem>>, vector<32x128xbf16>
    %c0_1 = arith.constant 0 : index
    %c0_2 = arith.constant 0 : index
    %1 = vector.load %arg2[%c0_1, %c0_2] : memref<128x32xbf16, #tpu.memory_space<vmem>>, vector<128x32xbf16>
    %cst = arith.constant dense<0.000000e+00> : vector<32x32xf32>
    %2 = tpu.matmul %0, %1, %cst {dimension_numbers = #tpu.dot_dimension_numbers<[1], [0], [0], [1], [0, 0, 1, 1], [], []>} : vector<32x128xbf16>, vector<128x32xbf16>, vector<32x32xf32> -> vector<32x32xf32>
    %c0_3 = arith.constant 0 : index
    %c0_4 = arith.constant 0 : index
    %3 = vector.load %arg3[%c0_3, %c0_4] : memref<1x32xf32, #tpu.memory_space<vmem>>, vector<1x32xf32>
    %4 = vector.broadcast %3 : vector<1x32xf32> to vector<32x32xf32>
    %5 = arith.addf %2, %4 : vector<32x32xf32>
    %cst_5 = arith.constant dense<0.000000e+00> : vector<32xf32>
    %6 = vector.multi_reduction <add>, %5, %cst_5 [1] : vector<32x32xf32> to vector<32xf32>
    %7 = vector.shape_cast %6 : vector<32xf32> to vector<32x1xf32>
    %cst_6 = arith.constant 3.200000e+01 : f32
    %8 = vector.broadcast %cst_6 : f32 to vector<32x1xf32>
    %9 = arith.divf %7, %8 : vector<32x1xf32>
    %10 = vector.broadcast %9 : vector<32x1xf32> to vector<32x32xf32>
    %11 = arith.subf %5, %10 : vector<32x32xf32>
    %12 = arith.mulf %11, %11 : vector<32x32xf32>
    %cst_7 = arith.constant dense<0.000000e+00> : vector<32xf32>
    %13 = vector.multi_reduction <add>, %12, %cst_7 [1] : vector<32x32xf32> to vector<32xf32>
    %14 = vector.shape_cast %13 : vector<32xf32> to vector<32x1xf32>
    %cst_8 = arith.constant 3.200000e+01 : f32
    %15 = vector.broadcast %cst_8 : f32 to vector<32x1xf32>
    %16 = arith.divf %14, %15 : vector<32x1xf32>
    %17 = vector.broadcast %9 : vector<32x1xf32> to vector<32x32xf32>
    %18 = arith.subf %5, %17 : vector<32x32xf32>
    %cst_9 = arith.constant 9.99999974E-6 : f32
    %19 = vector.broadcast %cst_9 : f32 to vector<32x1xf32>
    %20 = arith.addf %16, %19 : vector<32x1xf32>
    %21 = math.rsqrt %20 : vector<32x1xf32>
    %22 = vector.broadcast %21 : vector<32x1xf32> to vector<32x32xf32>
    %23 = arith.mulf %18, %22 : vector<32x32xf32>
    %c0_10 = arith.constant 0 : index
    %c0_11 = arith.constant 0 : index
    %24 = vector.load %arg4[%c0_10, %c0_11] : memref<1x32xf32, #tpu.memory_space<vmem>>, vector<1x32xf32>
    %25 = vector.broadcast %24 : vector<1x32xf32> to vector<32x32xf32>
    %26 = arith.mulf %23, %25 : vector<32x32xf32>
    %c0_12 = arith.constant 0 : index
    %c0_13 = arith.constant 0 : index
    %27 = vector.load %arg5[%c0_12, %c0_13] : memref<1x32xf32, #tpu.memory_space<vmem>>, vector<1x32xf32>
    %28 = vector.broadcast %27 : vector<1x32xf32> to vector<32x32xf32>
    %29 = arith.addf %26, %28 : vector<32x32xf32>
    %30 = arith.truncf %29 : vector<32x32xf32> to vector<32x32xbf16>
    %c0_14 = arith.constant 0 : index
    %c0_15 = arith.constant 0 : index
    %31 = vector.load %arg6[%c0_14, %c0_15] : memref<32x64xbf16, #tpu.memory_space<vmem>>, vector<32x64xbf16>
    %cst_16 = arith.constant dense<0.000000e+00> : vector<32x64xf32>
    %32 = tpu.matmul %30, %31, %cst_16 {dimension_numbers = #tpu.dot_dimension_numbers<[1], [0], [0], [1], [0, 0, 1, 1], [], []>} : vector<32x32xbf16>, vector<32x64xbf16>, vector<32x64xf32> -> vector<32x64xf32>
    %c0_17 = arith.constant 0 : index
    %c0_18 = arith.constant 0 : index
    %33 = vector.load %arg7[%c0_17, %c0_18] : memref<1x64xf32, #tpu.memory_space<vmem>>, vector<1x64xf32>
    %34 = vector.broadcast %33 : vector<1x64xf32> to vector<32x64xf32>
    %35 = arith.addf %32, %34 : vector<32x64xf32>
    %36 = arith.truncf %35 : vector<32x64xf32> to vector<32x64xbf16>
    %c0_19 = arith.constant 0 : index
    %c0_20 = arith.constant 0 : index
    %37 = vector.load %arg8[%c0_19, %c0_20] : memref<32x64xbf16, #tpu.memory_space<vmem>>, vector<32x64xbf16>
    tpu.vector_store %arg8[%c0_19, %c0_20], %36 {strides = array<i32>} : memref<32x64xbf16, #tpu.memory_space<vmem>>, vector<32x64xbf16>,
    return
  }
  func.func @transform_0(%arg0: i32) -> (i32, i32) {
    %c0_i32 = arith.constant 0 : i32
    %c0_i32_0 = arith.constant 0 : i32
    return %arg0, %c0_i32 : i32, i32
  }
  func.func @transform_1(%arg0: i32) -> (i32, i32) {
    %c0_i32 = arith.constant 0 : i32
    %c0_i32_0 = arith.constant 0 : i32
    %c0_i32_1 = arith.constant 0 : i32
    return %c0_i32, %c0_i32_0 : i32, i32
  }
  func.func @transform_2(%arg0: i32) -> (i32, i32) {
    %c0_i32 = arith.constant 0 : i32
    %c0_i32_0 = arith.constant 0 : i32
    %c0_i32_1 = arith.constant 0 : i32
    return %c0_i32, %c0_i32_0 : i32, i32
  }
  func.func @transform_3(%arg0: i32) -> (i32, i32) {
    %c0_i32 = arith.constant 0 : i32
    %c0_i32_0 = arith.constant 0 : i32
    %c0_i32_1 = arith.constant 0 : i32
    return %c0_i32, %c0_i32_0 : i32, i32
  }
  func.func @transform_4(%arg0: i32) -> (i32, i32) {
    %c0_i32 = arith.constant 0 : i32
    %c0_i32_0 = arith.constant 0 : i32
    %c0_i32_1 = arith.constant 0 : i32
    return %c0_i32, %c0_i32_0 : i32, i32
  }
  func.func @transform_5(%arg0: i32) -> (i32, i32) {
    %c0_i32 = arith.constant 0 : i32
    %c0_i32_0 = arith.constant 0 : i32
    %c0_i32_1 = arith.constant 0 : i32
    return %c0_i32, %c0_i32_0 : i32, i32
  }
  func.func @transform_6(%arg0: i32) -> (i32, i32) {
    %c0_i32 = arith.constant 0 : i32
    %c0_i32_0 = arith.constant 0 : i32
    %c0_i32_1 = arith.constant 0 : i32
    return %c0_i32, %c0_i32_0 : i32, i32
  }
  func.func @transform_7(%arg0: i32) -> (i32, i32) {
    %c0_i32 = arith.constant 0 : i32
    %c0_i32_0 = arith.constant 0 : i32
    return %arg0, %c0_i32 : i32, i32
  }
}

</mosaic_0001>

<bundles_post_ra>
// kernel: tpu_custom_call.1
= control target key start
LH: loop header
LB: loop body
LE: loop exit
PB: predicated region body
PF: predicated region fallthrough
CT: control target
= control target key end

     0   :  { %s589_s0 = inlined_call_operand.vmem [shape: bf16[32,128], index: 0, kind: input, shape index: {}]   ;;  %s590_s1 = inlined_call_operand.vmem [shape: bf16[128,32], index: 1, kind: input, shape index: {}]   ;;  %s591_s2 = inlined_call_operand.vmem [shape: f32[1,32], index: 2, kind: input, shape index: {}]   ;;  %s592_s3 = inlined_call_operand.vmem [shape: f32[1,32], index: 3, kind: input, shape index: {}]   ;;  %s593_s4 = inlined_call_operand.vmem [shape: f32[1,32], index: 4, kind: input, shape index: {}]   ;;  %s594_s5 = inlined_call_operand.vmem [shape: bf16[32,64], index: 5, kind: input, shape index: {}]   ;;  %s595_s6 = inlined_call_operand.vmem [shape: f32[1,64], index: 6, kind: input, shape index: {}]   ;;  %s596_s7 = inlined_call_operand.hbm [shape: bf16[32,64], index: 7, kind: output, shape index: {}]  }
   0x1   :  { %v428_v0 = vld [vmem:[%s590_s1] sm:$0xff]   ;;  %v429_v1 = vld [vmem:[%s590_s1 + $0x8] sm:$0xff]   ;;  %v430_v2 = vld [vmem:[%s590_s1 + $0x10] sm:$0xff]  }
   0x2   :  { %397 = vmatprep.subr.bf16.mxu0 %v428_v0  ;;  %v431_v3 = vld [vmem:[%s590_s1 + $0x18] sm:$0xff]   ;;  %v436_v4 = vld [vmem:[%s589_s0] sm:$0xff]  }
   0x3   :  { %398 = vmatpush3.bf16.msra.mxu0 %v428_v0  ;;  %413 = vmatprep.mubr.bf16.mxu0 %v436_v4 }
   0x4   :  { %399 = vmatprep.subr.bf16.mxu0 %v429_v1 }
   0x7   :  { %400 = vmatpush3.bf16.msra.mxu0 %v429_v1 }
   0x8   :  { %401 = vmatprep.subr.bf16.mxu0 %v430_v2 }
   0xb   :  { %402 = vmatpush3.bf16.msra.mxu0 %v430_v2 }
   0xc   :  { %12 = vsyncpa [#allocation3], 0  ;;  %403 = vmatprep.subr.bf16.mxu0 %v431_v3  ;;  %v432_v5 = vld [vmem:[%s590_s1 + $0x20] sm:$0xff]   ;;  %v433_v6 = vld [vmem:[%s590_s1 + $0x28] sm:$0xff]   ;;  %vm164_vm0 = vcmask 261120   ;;  %vm336_vm1 = vcmask 519168  }
   0xd   :  { %v434_v7 = vld [vmem:[%s590_s1 + $0x30] sm:$0xff]   ;;  %v435_v8 = vld [vmem:[%s590_s1 + $0x38] sm:$0xff]   ;;  %v437_v9 = vld [vmem:[%s589_s0 + $0x8] sm:$0xff]  }
   0xe   :  { %v357_v10 = vld [vmem:[%s591_s2] ss:$0 sm:$0xff]  ;;  %v439_v44 = vld [vmem:[%s594_s5 + $0x8] sm:$0xff]  }
   0xf   :  { %404 = vmatpush3.bf16.msra.mxu0 %v431_v3  ;;  %v438_v43 = vld [vmem:[%s594_s5] sm:$0xff]  }
  0x10   :  { %405 = vmatprep.subr.bf16.mxu0 %v432_v5  ;;  %417 = vmatprep.subr.bf16.mxu1 %v438_v43  ;;  %v368_v59 = vld [vmem:[%s592_s3] ss:$0 sm:$0xff] }
  0x11   :  { %418 = vmatpush3.bf16.msra.mxu1 %v438_v43  ;;  %v369_v1 = vld [vmem:[%s593_s4] ss:$0 sm:$0xff]  ;;  %s472_s4 = smov [#allocation2]  }
  0x12   :  { %419 = vmatprep.subr.bf16.mxu1 %v439_v44  ;;  %s346_s28 = sshll.u32 %s472_s4, 4  ;;  %s347_s28 = int_to_ptr.vmem [resolvable:$true] %s346_s28 }
  0x13   :  { %406 = vmatpush3.bf16.msra.mxu0 %v432_v5  ;;  %p453_p1 = scmp.lt.s32.totalorder %s347_s28, %s347_s28 }
  0x14   :  { %407 = vmatprep.subr.bf16.mxu0 %v433_v6 }
  0x15   :  { %420 = vmatpush3.bf16.msra.mxu1 %v439_v44 }
  0x17   :  { %408 = vmatpush3.bf16.msra.mxu0 %v433_v6 }
  0x18   :  { %409 = vmatprep.subr.bf16.mxu0 %v434_v7 }
  0x1b   :  { %410 = vmatpush3.bf16.msra.mxu0 %v434_v7 }
  0x1c   :  { %411 = vmatprep.subr.bf16.mxu0 %v435_v8 }
  0x1f   :  { %412 = vmatpush3.bf16.msra.mxu0 %v435_v8 }
  0x22   :  { %414 = vmatmul.mubr.bf16.vlgmr.msra.gmra.mrb[0].mxu0 %v437_v9 }
  0xf5   :  { %v415_v11 = vpop.f32.mrb[0].mxu0 }
  0xf6   :  { %v158_v12 = vadd.f32 %v415_v11, %v357_v10  ;;  %v149_v13 = vpop.f32.mrb[1].mxu0 }
  0xf7   :  { %v150_v14 = vadd.f32 %v357_v10, %v149_v13  ;;  %v416_v15 = vpop.f32.mrb[2].mxu0  ;;  %v370_v13 = vld [vmem:[%s595_s6] ss:$0 sm:$0xff]  ;;  %s448_s6 = scalar_lea.vmem %s347_s28, 256 }
  0xf8   :  { %v161_v16 = vadd.f32 %v416_v15, %v357_v10  ;;  %v152_v17 = vpop.f32.mrb[3].mxu0  ;;  %v171_v18 = vsel %vm164_vm0, %v158_v12, 0.0  ;;  %p449_p0 = scmp.ne.s32.totalorder %s347_s28, %s448_s6  ;;  %p454_p2 = scmp.lt.s32.totalorder %s448_s6, %s448_s6 }
  0xf9   :  { %v153_v19 = vadd.f32 %v357_v10, %v152_v17  ;;  %172 = vadd.xlane.f32.xlu1 %v171_v18  ;;  %v165_v20 = vsel %vm164_vm0, %v150_v14, 0.0 }
  0xfa   :  { %166 = vadd.xlane.f32.xlu0 %v165_v20  ;;  %v174_v21 = vsel %vm164_vm0, %v161_v16, 0.0  ;;  %p455_p3 = por %p454_p2, %p453_p1 }
  0xfb   :  { %v168_v22 = vsel %vm164_vm0, %v153_v19, 0.0 }
  0xfc   :  { %p456_p4 = pnand %p455_p3, %p449_p0 }
  0xfd   :  { %175 = vadd.xlane.f32.xlu1 %v174_v21 }
  0xfe   :  { %169 = vadd.xlane.f32.xlu0 %v168_v22 }
 0x186   :  { %v173_v23 = vpop.xlane.xlu1 %172 }
 0x187   :  { %v180_v24 = vmul.f32 0.03125, %v173_v23  ;;  %v167_v25 = vpop.xlane.xlu0 %166 }
 0x188   :  { %v178_v26 = vmul.f32 0.03125, %v167_v25 }
 0x189   :  { %v184_v27 = vsub.f32 %v158_v12, %v180_v24 }
 0x18a   :  { %v182_v28 = vsub.f32 %v150_v14, %v178_v26  ;;  %v176_v29 = vpop.xlane.xlu1 %175 }
 0x18b   :  { %v181_v30 = vmul.f32 0.03125, %v176_v29  ;;  %v170_v31 = vpop.xlane.xlu0 %169  ;;  %v188_v37 = vmul.f32 %v184_v27, %v184_v27 }
 0x18c   :  { %v179_v32 = vmul.f32 0.03125, %v170_v31  ;;  %v186_v33 = vmul.f32 %v182_v28, %v182_v28 }
 0x18d   :  { %v185_v34 = vsub.f32 %v161_v16, %v181_v30  ;;  %v196_v39 = vsel %vm164_vm0, %v188_v37, 0.0 }
 0x18e   :  { %v183_v35 = vsub.f32 %v153_v19, %v179_v32  ;;  %v190_v36 = vsel %vm164_vm0, %v186_v33, 0.0 }
 0x18f   :  { %191 = vadd.xlane.f32.xlu0 %v190_v36  ;;  %v189_v41 = vmul.f32 %v185_v34, %v185_v34 }
 0x190   :  { %v187_v38 = vmul.f32 %v183_v35, %v183_v35 }
 0x191   :  { %v199_v42 = vsel %vm164_vm0, %v189_v41, 0.0 }
 0x192   :  { %v193_v40 = vsel %vm164_vm0, %v187_v38, 0.0 }
 0x193   :  { %197 = vadd.xlane.f32.xlu0 %v196_v39  ;;  %194 = vadd.xlane.f32.xlu1 %v193_v40 }
 0x197   :  { %200 = vadd.xlane.f32.xlu1 %v199_v42 }
 0x21c   :  { %v192_v45 = vpop.xlane.xlu0 %191 }
 0x21d   :  { %v202_v46 = vmul.f32 0.03125, %v192_v45 }
 0x21f   :  { %v206_v47 = vadd.f32 1e-05, %v202_v46 }
 0x220   :  { %v195_v48 = vpop.xlane.xlu1 %194  ;;  %v198_v49 = vpop.xlane.xlu0 %197 }
 0x221   :  { %440 = vrsqrt.f32 %v206_v47  ;;  %v203_v50 = vmul.f32 0.03125, %v195_v48  ;;  %v204_v51 = vmul.f32 0.03125, %v198_v49 }
 0x223   :  { %v207_v52 = vadd.f32 1e-05, %v203_v50  ;;  %v208_v53 = vadd.f32 1e-05, %v204_v51 }
 0x224   :  { %v201_v54 = vpop.xlane.xlu1 %200 }
 0x225   :  { %442 = vrsqrt.f32 %v207_v52  ;;  %v205_v55 = vmul.f32 0.03125, %v201_v54 }
 0x226   :  { %444 = vrsqrt.f32 %v208_v53 }
 0x227   :  { %v209_v56 = vadd.f32 1e-05, %v205_v55 }
 0x229   :  { %446 = vrsqrt.f32 %v209_v56 }
 0x22b   :  { %v441_v57 = vpop.eup %440 }
 0x22c   :  { %v214_v58 = vmul.f32 %v441_v57, %v182_v28 }
 0x22e   :  { %v225_v63 = vmul.f32 %v368_v59, %v214_v58 }
 0x22f   :  { %v443_v60 = vpop.eup %442 }
 0x230   :  { %v445_v61 = vpop.eup %444  ;;  %v215_v62 = vmul.f32 %v443_v60, %v183_v35  ;;  %v236_v5 = vadd.f32 %v369_v1, %v225_v63 }
 0x231   :  { %v216_v0 = vmul.f32 %v445_v61, %v184_v27 }
 0x232   :  { %v226_v2 = vmul.f32 %v368_v59, %v215_v62 }
 0x233   :  { %v447_v3 = vpop.eup %446  ;;  %v227_v7 = vmul.f32 %v368_v59, %v216_v0 }
 0x234   :  { %v217_v4 = vmul.f32 %v447_v3, %v185_v34  ;;  %v237_v6 = vadd.f32 %v369_v1, %v226_v2 }
 0x235   :  { %v238_v10 = vadd.f32 %v369_v1, %v227_v7 }
 0x236   :  { %v240_v8 = vpack.c.bf16 %v237_v6, %v236_v5  ;;  %v228_v9 = vmul.f32 %v368_v59, %v217_v4 }
 0x238   :  { %421 = vmatprep.mubr.msk.bf16.mxu1 %vm164_vm0, %v240_v8  ;;  %v239_v11 = vadd.f32 %v369_v1, %v228_v9 }
 0x23a   :  { %v241_v12 = vpack.c.bf16 %v239_v11, %v238_v10 }
 0x23c   :  { %422 = vmatmul.mubr.msk.bf16.vlgmr.msra.gmra.mrb[0].mxu1 %vm164_vm0, %v241_v12 }
 0x30f   :  { %v423_v14 = vpop.f32.mrb[0].mxu1 }
 0x310   :  { %v314_v15 = vadd.f32 %v423_v14, %v370_v13  ;;  %v305_v16 = vpop.f32.mrb[1].mxu1 }
 0x311   :  { %v306_v17 = vadd.f32 %v370_v13, %v305_v16  ;;  %v424_v18 = vpop.f32.mrb[2].mxu1 }
 0x312   :  { %v381_v19 = vpack.c.bf16 %v314_v15, %v314_v15  ;;  %v317_v20 = vadd.f32 %v424_v18, %v370_v13  ;;  %v308_v21 = vpop.f32.mrb[3].mxu1 }
 0x313   :  { %v379_v22 = vpack.c.bf16 %v306_v17, %v306_v17  ;;  %v309_v23 = vadd.f32 %v370_v13, %v308_v21 }
 0x314   :  { %339 = vst.msk [vmem:[#allocation2 + $0x8] sm:$0xf] %vm336_vm1, %v381_v19  ;;  %v382_v24 = vpack.c.bf16 %v317_v20, %v317_v20 }
 0x315   :  { %337 = vst.msk [vmem:[#allocation2] sm:$0xf] %vm336_vm1, %v379_v22  ;;  %v380_v25 = vpack.c.bf16 %v309_v23, %v309_v23 }
 0x316   :  { %340 = vst.msk [vmem:[#allocation2 + $0xc] sm:$0xf] %vm336_vm1, %v382_v24 }
 0x317   :  { %338 = vst.msk [vmem:[#allocation2 + $0x4] sm:$0xf] %vm336_vm1, %v380_v25 }
 0x318   :  { %459 = shalt.err (!%p456_p4)
}
 0x319   :  { %s460_s8 = scalar_lea.hbm %s596_s7, 256 }
 0x31a   :  { %p461_p5 = scmp.ne.s32.totalorder %s596_s7, %s460_s8  ;;  %p464_p6 = scmp.lt.u32.totalorder %s460_s8, %s596_s7 }
 0x31c   :  { %p466_p7 = pnand %p464_p6, %p461_p5 }
 0x31e   :  { %469 = shalt.err (!%p466_p7)
}
 0x31f   :  { %s473_s13 = smov 64   ;;  %s474_s14 = smov 4  }
 0x320   :  { %352 = dma.vmem_to_hbm [thread:$0]  %s347_s28, 256, %s596_s7, [#allocation3], %s473_s13, %s473_s13, %s474_s14  }
 0x321   :  { %470 = dma.done.wait [#allocation3], 256  }
 0x322   :  { %471 = vsyncadd [#allocation3], 4294967040 }
 0x323   :  { %356 = vsyncpa [#allocation3], 1 }

</bundles_post_ra>
